<compile_context>
chip_gen: v6e
topology: v6e:2x2x1
jax: 0.10.0
libtpu: 0.0.40
codegen_flags: <defaults>
</compile_context>

<pallas_src>
import numpy as np
import jax
import jax.numpy as jnp
from jax.experimental import pallas as pl
from jax.experimental.pallas import tpu as pltpu

LANE = 128
SUBLANE = 8


def _round_up(x, m):
    return (x + m - 1) // m * m


# ----------------------------------------------------------------------------
# Fused MLP kernel: o = (relu(relu(x@W1+b1)@W2+b2))@W3 + b3 for one M tile.
# Weights / biases are full (lane-padded) blocks and stay resident in VMEM.
# ----------------------------------------------------------------------------
def _mlp_kernel(x_ref, w1_ref, b1_ref, w2_ref, b2_ref, w3_ref, b3_ref, o_ref):
    h = jnp.dot(x_ref[...], w1_ref[...], preferred_element_type=jnp.float32)
    h = jnp.maximum(h + b1_ref[...], 0.0)                       # fc1 + ReLU
    h = jnp.dot(h.astype(w2_ref.dtype), w2_ref[...],
                preferred_element_type=jnp.float32)
    h = jnp.maximum(h + b2_ref[...], 0.0)                       # fc2 + ReLU
    o = jnp.dot(h.astype(w3_ref.dtype), w3_ref[...],
                preferred_element_type=jnp.float32)
    o_ref[...] = (o + b3_ref[...]).astype(o_ref.dtype)          # fc3


def mnist_2nn_forward(params, inputs, *, tm=256, compute_dtype=jnp.float32):
    """Forward pass of Mnist_2NN. inputs: (B, 784) float32."""
    x = inputs.reshape(-1, 784).astype(jnp.float32)
    M, K = x.shape

    # --- pad layer widths to lane multiples (zero pad is exact) -------------
    H1 = _round_up(200, LANE)   # 256
    H2 = _round_up(200, LANE)   # 256
    NO = _round_up(10, LANE)    # 128

    w1 = jnp.zeros((K, H1), jnp.float32).at[:, :200].set(params["w1"])
    b1 = jnp.zeros((1, H1), jnp.float32).at[:, :200].set(params["b1"])
    w2 = jnp.zeros((H1, H2), jnp.float32).at[:200, :200].set(params["w2"])
    b2 = jnp.zeros((1, H2), jnp.float32).at[:, :200].set(params["b2"])
    w3 = jnp.zeros((H2, NO), jnp.float32).at[:200, :10].set(params["w3"])
    b3 = jnp.zeros((1, NO), jnp.float32).at[:, :10].set(params["b3"])

    # --- M tiling: pad batch rows so the tile divides evenly ----------------
    tm_eff = min(tm, _round_up(M, SUBLANE))
    Mp = _round_up(M, tm_eff)
    if Mp != M:
        x = jnp.pad(x, ((0, Mp - M), (0, 0)))

    cd = compute_dtype
    out = pl.pallas_call(
        _mlp_kernel,
        out_shape=jax.ShapeDtypeStruct((Mp, NO), jnp.float32),
        grid=(Mp // tm_eff,),
        in_specs=[
            pl.BlockSpec((tm_eff, K), lambda i: (i, 0)),   # x tile (streamed)
            pl.BlockSpec((K, H1), lambda i: (0, 0)),       # W1 (resident)
            pl.BlockSpec((1, H1), lambda i: (0, 0)),       # b1
            pl.BlockSpec((H1, H2), lambda i: (0, 0)),      # W2
            pl.BlockSpec((1, H2), lambda i: (0, 0)),       # b2
            pl.BlockSpec((H2, NO), lambda i: (0, 0)),      # W3
            pl.BlockSpec((1, NO), lambda i: (0, 0)),       # b3
        ],
        out_specs=pl.BlockSpec((tm_eff, NO), lambda i: (i, 0)),
        compiler_params=pltpu.CompilerParams(
            dimension_semantics=("parallel",),
            vmem_limit_bytes=48 * 1024 * 1024,
        ),
    )(x.astype(cd), w1.astype(cd), b1, w2.astype(cd), b2, w3.astype(cd), b3)

    return out[:M, :10]


# ----------------------------------------------------------------------------
# Deterministic synthetic parameters (shapes from Mnist_2NN.__init__), stored
# as (in, out) for x @ W (transpose of PyTorch's (out, in) Linear weight).
# ----------------------------------------------------------------------------
def init_params(key):
    ks = jax.random.split(key, 6)

    def u(k, shape, fan_in):
        bound = 1.0 / np.sqrt(fan_in)
        return jax.random.uniform(k, shape, jnp.float32, -bound, bound)

    return dict(
        w1=u(ks[0], (784, 200), 784), b1=u(ks[1], (200,), 784),
        w2=u(ks[2], (200, 200), 200), b2=u(ks[3], (200,), 200),
        w3=u(ks[4], (200, 10), 200),  b3=u(ks[5], (10,), 200),
    )


# Pure-JAX reference (same math via XLA) for a correctness check.
def reference_forward(params, inputs):
    hp = jax.lax.Precision.HIGHEST
    x = inputs.reshape(-1, 784).astype(jnp.float32)
    h = jnp.maximum(jnp.dot(x, params["w1"], precision=hp) + params["b1"], 0.0)
    h = jnp.maximum(jnp.dot(h, params["w2"], precision=hp) + params["b2"], 0.0)
    return jnp.dot(h, params["w3"], precision=hp) + params["b3"]


if __name__ == "__main__":
    key = jax.random.PRNGKey(0)
    pkey, xkey = jax.random.split(key)
    params = init_params(pkey)
    x = jax.random.normal(xkey, (2, 784), dtype=jnp.float32)  # batch=2 MNIST rows

    out = jax.block_until_ready(mnist_2nn_forward(params, x))
    ref = reference_forward(params, x)

    assert out.shape == (2, 10), out.shape
    assert bool(jnp.allclose(out, ref, rtol=2e-2, atol=2e-3)), "mismatch vs reference"
    print("KERNEL_OK")
</pallas_src>

<mosaic_0001>
module attributes {stable_mosaic.version = 11 : i64} {
  func.func @_mlp_kernel(%arg0: i32, %arg1: memref<8x784xf32, #tpu.memory_space<vmem>>, %arg2: memref<784x256xf32, #tpu.memory_space<vmem>>, %arg3: memref<1x256xf32, #tpu.memory_space<vmem>>, %arg4: memref<256x256xf32, #tpu.memory_space<vmem>>, %arg5: memref<1x256xf32, #tpu.memory_space<vmem>>, %arg6: memref<256x128xf32, #tpu.memory_space<vmem>>, %arg7: memref<1x128xf32, #tpu.memory_space<vmem>>, %arg8: memref<8x128xf32, #tpu.memory_space<vmem>>) attributes {dimension_semantics = [#tpu.dimension_semantics<parallel>], iteration_bounds = array<i64: 1>, scalar_prefetch = 0 : i64, scratch_operands = 0 : i64, tpu.core_type = #tpu.core_type<tc>, window_params = [{transform_indices = @transform_0, window_bounds = array<i64: 8, 784>}, {pipeline_mode = #tpu.pipeline_mode<synchronous>, transform_indices = @transform_1, window_bounds = array<i64: 784, 256>}, {pipeline_mode = #tpu.pipeline_mode<synchronous>, transform_indices = @transform_2, window_bounds = array<i64: 1, 256>}, {pipeline_mode = #tpu.pipeline_mode<synchronous>, transform_indices = @transform_3, window_bounds = array<i64: 256, 256>}, {pipeline_mode = #tpu.pipeline_mode<synchronous>, transform_indices = @transform_4, window_bounds = array<i64: 1, 256>}, {pipeline_mode = #tpu.pipeline_mode<synchronous>, transform_indices = @transform_5, window_bounds = array<i64: 256, 128>}, {pipeline_mode = #tpu.pipeline_mode<synchronous>, transform_indices = @transform_6, window_bounds = array<i64: 1, 128>}, {transform_indices = @transform_7, window_bounds = array<i64: 8, 128>}]} {
    %c0 = arith.constant 0 : index
    %c0_0 = arith.constant 0 : index
    %0 = vector.load %arg1[%c0, %c0_0] : memref<8x784xf32, #tpu.memory_space<vmem>>, vector<8x784xf32>
    %c0_1 = arith.constant 0 : index
    %c0_2 = arith.constant 0 : index
    %1 = vector.load %arg2[%c0_1, %c0_2] : memref<784x256xf32, #tpu.memory_space<vmem>>, vector<784x256xf32>
    %cst = arith.constant dense<0.000000e+00> : vector<8x256xf32>
    %2 = tpu.matmul %0, %1, %cst {dimension_numbers = #tpu.dot_dimension_numbers<[1], [0], [0], [1], [0, 0, 1, 1], [], []>} : vector<8x784xf32>, vector<784x256xf32>, vector<8x256xf32> -> vector<8x256xf32>
    %c0_3 = arith.constant 0 : index
    %c0_4 = arith.constant 0 : index
    %3 = vector.load %arg3[%c0_3, %c0_4] : memref<1x256xf32, #tpu.memory_space<vmem>>, vector<1x256xf32>
    %4 = vector.broadcast %3 : vector<1x256xf32> to vector<8x256xf32>
    %5 = arith.addf %2, %4 : vector<8x256xf32>
    %cst_5 = arith.constant 0.000000e+00 : f32
    %6 = vector.broadcast %cst_5 : f32 to vector<8x256xf32>
    %7 = arith.maximumf %5, %6 : vector<8x256xf32>
    %c0_6 = arith.constant 0 : index
    %c0_7 = arith.constant 0 : index
    %8 = vector.load %arg4[%c0_6, %c0_7] : memref<256x256xf32, #tpu.memory_space<vmem>>, vector<256x256xf32>
    %cst_8 = arith.constant dense<0.000000e+00> : vector<8x256xf32>
    %9 = tpu.matmul %7, %8, %cst_8 {dimension_numbers = #tpu.dot_dimension_numbers<[1], [0], [0], [1], [0, 0, 1, 1], [], []>} : vector<8x256xf32>, vector<256x256xf32>, vector<8x256xf32> -> vector<8x256xf32>
    %c0_9 = arith.constant 0 : index
    %c0_10 = arith.constant 0 : index
    %10 = vector.load %arg5[%c0_9, %c0_10] : memref<1x256xf32, #tpu.memory_space<vmem>>, vector<1x256xf32>
    %11 = vector.broadcast %10 : vector<1x256xf32> to vector<8x256xf32>
    %12 = arith.addf %9, %11 : vector<8x256xf32>
    %cst_11 = arith.constant 0.000000e+00 : f32
    %13 = vector.broadcast %cst_11 : f32 to vector<8x256xf32>
    %14 = arith.maximumf %12, %13 : vector<8x256xf32>
    %c0_12 = arith.constant 0 : index
    %c0_13 = arith.constant 0 : index
    %15 = vector.load %arg6[%c0_12, %c0_13] : memref<256x128xf32, #tpu.memory_space<vmem>>, vector<256x128xf32>
    %cst_14 = arith.constant dense<0.000000e+00> : vector<8x128xf32>
    %16 = tpu.matmul %14, %15, %cst_14 {dimension_numbers = #tpu.dot_dimension_numbers<[1], [0], [0], [1], [0, 0, 1, 1], [], []>} : vector<8x256xf32>, vector<256x128xf32>, vector<8x128xf32> -> vector<8x128xf32>
    %c0_15 = arith.constant 0 : index
    %c0_16 = arith.constant 0 : index
    %17 = vector.load %arg7[%c0_15, %c0_16] : memref<1x128xf32, #tpu.memory_space<vmem>>, vector<1x128xf32>
    %18 = vector.broadcast %17 : vector<1x128xf32> to vector<8x128xf32>
    %19 = arith.addf %16, %18 : vector<8x128xf32>
    %c0_17 = arith.constant 0 : index
    %c0_18 = arith.constant 0 : index
    %20 = vector.load %arg8[%c0_17, %c0_18] : memref<8x128xf32, #tpu.memory_space<vmem>>, vector<8x128xf32>
    tpu.vector_store %arg8[%c0_17, %c0_18], %19 {strides = array<i32>} : memref<8x128xf32, #tpu.memory_space<vmem>>, vector<8x128xf32>,
    return
  }
  func.func @transform_0(%arg0: i32) -> (i32, i32) {
    %c0_i32 = arith.constant 0 : i32
    %c0_i32_0 = arith.constant 0 : i32
    return %arg0, %c0_i32 : i32, i32
  }
  func.func @transform_1(%arg0: i32) -> (i32, i32) {
    %c0_i32 = arith.constant 0 : i32
    %c0_i32_0 = arith.constant 0 : i32
    %c0_i32_1 = arith.constant 0 : i32
    return %c0_i32, %c0_i32_0 : i32, i32
  }
  func.func @transform_2(%arg0: i32) -> (i32, i32) {
    %c0_i32 = arith.constant 0 : i32
    %c0_i32_0 = arith.constant 0 : i32
    %c0_i32_1 = arith.constant 0 : i32
    return %c0_i32, %c0_i32_0 : i32, i32
  }
  func.func @transform_3(%arg0: i32) -> (i32, i32) {
    %c0_i32 = arith.constant 0 : i32
    %c0_i32_0 = arith.constant 0 : i32
    %c0_i32_1 = arith.constant 0 : i32
    return %c0_i32, %c0_i32_0 : i32, i32
  }
  func.func @transform_4(%arg0: i32) -> (i32, i32) {
    %c0_i32 = arith.constant 0 : i32
    %c0_i32_0 = arith.constant 0 : i32
    %c0_i32_1 = arith.constant 0 : i32
    return %c0_i32, %c0_i32_0 : i32, i32
  }
  func.func @transform_5(%arg0: i32) -> (i32, i32) {
    %c0_i32 = arith.constant 0 : i32
    %c0_i32_0 = arith.constant 0 : i32
    %c0_i32_1 = arith.constant 0 : i32
    return %c0_i32, %c0_i32_0 : i32, i32
  }
  func.func @transform_6(%arg0: i32) -> (i32, i32) {
    %c0_i32 = arith.constant 0 : i32
    %c0_i32_0 = arith.constant 0 : i32
    %c0_i32_1 = arith.constant 0 : i32
    return %c0_i32, %c0_i32_0 : i32, i32
  }
  func.func @transform_7(%arg0: i32) -> (i32, i32) {
    %c0_i32 = arith.constant 0 : i32
    %c0_i32_0 = arith.constant 0 : i32
    return %arg0, %c0_i32 : i32, i32
  }
}

</mosaic_0001>

<bundles_post_ra>
// kernel: tpu_custom_call.1
= control target key start
LH: loop header
LB: loop body
LE: loop exit
PB: predicated region body
PF: predicated region fallthrough
CT: control target
= control target key end

     0   :  { %12 = vsyncpa [#allocation3], 0  ;;  %s1090_s0 = inlined_call_operand.hbm [shape: f32[8,784], index: 0, kind: input, shape index: {}]   ;;  %s1091_s1 = inlined_call_operand.hbm [shape: f32[784,256], index: 1, kind: input, shape index: {}]   ;;  %s1092_s2 = inlined_call_operand.vmem [shape: f32[1,256], index: 2, kind: input, shape index: {}]   ;;  %s1093_s3 = inlined_call_operand.hbm [shape: f32[256,256], index: 3, kind: input, shape index: {}]   ;;  %s1094_s4 = inlined_call_operand.vmem [shape: f32[1,256], index: 4, kind: input, shape index: {}]   ;;  %s1095_s5 = inlined_call_operand.hbm [shape: f32[256,128], index: 5, kind: input, shape index: {}]   ;;  %s1096_s6 = inlined_call_operand.vmem [shape: f32[1,128], index: 6, kind: input, shape index: {}]   ;;  %s1097_s7 = inlined_call_operand.hbm [shape: f32[8,128], index: 7, kind: output, shape index: {}]  }
   0x1   :  { %13 = vsyncpa [#allocation6], 0 }
   0x2   :  { %14 = vsyncpa [#allocation9], 0 }
   0x3   :  { %15 = vsyncpa [#allocation4], 0  ;;  %s1016_s24 = smov [#allocation5]  }
   0x4   :  { %s31_s25 = sshll.u32 %s1016_s24, 4  ;;  %s32_s25 = int_to_ptr.vmem [resolvable:$true] %s31_s25 }
   0x5   :  { %s916_s26 = scalar_lea.vmem %s32_s25, 25088  ;;  %p921_p1 = scmp.lt.s32.totalorder %s32_s25, %s32_s25 }
   0x6   :  { %p917_p0 = scmp.ne.s32.totalorder %s32_s25, %s916_s26  ;;  %p922_p2 = scmp.lt.s32.totalorder %s916_s26, %s916_s26 }
   0x8   :  { %p923_p3 = por %p922_p2, %p921_p1 }
   0xa   :  { %p924_p4 = pnand %p923_p3, %p917_p0 }
   0xc   :  { %927 = shalt.err (!%p924_p4)
}
   0xd   :  { %s1017_s27 = smov 256   ;;  %s1018_s28 = smov 16  }
   0xe   :  { %37 = dma.hbm_to_vmem [thread:$0]  %s1091_s1, 25088, %s32_s25, [#allocation6], %s1017_s27, %s1017_s27, %s1018_s28  }
   0xf   :  { %s1019_s8 = smov [#allocation2]   ;;  %s1020_s10 = smov [#allocation7]  }
  0x10   :  { %s22_s9 = sshll.u32 %s1019_s8, 4  ;;  %s45_s11 = sshll.u32 %s1020_s10, 4  ;;  %s23_s9 = int_to_ptr.vmem [resolvable:$true] %s22_s9  ;;  %s46_s11 = int_to_ptr.vmem [resolvable:$true] %s45_s11 }
  0x11   :  { %s936_s12 = scalar_lea.vmem %s23_s9, 896  ;;  %p941_p6 = scmp.lt.s32.totalorder %s23_s9, %s23_s9 }
  0x12   :  { %p937_p5 = scmp.ne.s32.totalorder %s23_s9, %s936_s12  ;;  %p942_p7 = scmp.lt.s32.totalorder %s936_s12, %s936_s12 }
  0x14   :  { %p943_p8 = por %p942_p7, %p941_p6 }
  0x16   :  { %p944_p9 = pnand %p943_p8, %p937_p5 }
  0x18   :  { %947 = shalt.err (!%p944_p9)
}
  0x19   :  { %25 = dma.hbm_to_vmem [thread:$0]  %s1090_s0, 896, %s23_s9, [#allocation3]  }
  0x1a   :  { %s956_s15 = scalar_lea.vmem %s46_s11, 8192  ;;  %p961_p11 = scmp.lt.s32.totalorder %s46_s11, %s46_s11 }
  0x1b   :  { %p957_p10 = scmp.ne.s32.totalorder %s46_s11, %s956_s15  ;;  %p962_p12 = scmp.lt.s32.totalorder %s956_s15, %s956_s15 }
  0x1d   :  { %p963_p13 = por %p962_p12, %p961_p11 }
  0x1f   :  { %p964_p0 = pnand %p963_p13, %p957_p10 }
  0x21   :  { %967 = shalt.err (!%p964_p0)
}
  0x22   :  { %51 = dma.hbm_to_vmem [thread:$0]  %s1093_s3, 8192, %s46_s11, [#allocation6], %s1017_s27, %s1017_s27, %s1018_s28  }
  0x23   :  { %s1021_s17 = smov [#allocation8]  }
  0x24   :  { %s59_s18 = sshll.u32 %s1021_s17, 4  ;;  %s60_s18 = int_to_ptr.vmem [resolvable:$true] %s59_s18 }
  0x25   :  { %s976_s19 = scalar_lea.vmem %s60_s18, 4096  ;;  %p981_p2 = scmp.lt.s32.totalorder %s60_s18, %s60_s18 }
  0x26   :  { %p977_p1 = scmp.ne.s32.totalorder %s60_s18, %s976_s19  ;;  %p982_p3 = scmp.lt.s32.totalorder %s976_s19, %s976_s19 }
  0x28   :  { %p983_p4 = por %p982_p3, %p981_p2 }
  0x2a   :  { %p984_p5 = pnand %p983_p4, %p977_p1 }
  0x2c   :  { %987 = shalt.err (!%p984_p5)
}
  0x2d   :  { %s1022_s0 = smov 128   ;;  %s1023_s20 = smov 8  }
  0x2e   :  { %65 = dma.hbm_to_vmem [thread:$0]  %s1095_s5, 4096, %s60_s18, [#allocation9], %s1022_s0, %s1022_s0, %s1023_s20  }
  0x2f   :  { %1008 = dma.done.wait [#allocation3], 896  }
  0x30   :  { %1009 = vsyncadd [#allocation3], 4294966400 }
  0x31   :  { %1010 = dma.done.wait [#allocation6], 33280  }
  0x32   :  { %1011 = vsyncadd [#allocation6], 4294934016 }
  0x33   :  { %1012 = dma.done.wait [#allocation9], 4096  }
  0x34   :  { %1013 = vsyncadd [#allocation9], 4294963200  ;;  %v118_v0 = vld [vmem:[#allocation5 + $0xf8] sm:$0xff]  ;;  %v117_v1 = vld [vmem:[#allocation5 + $0xf0] sm:$0xff]  ;;  %vm295_vm0 = vcmask 130048   ;;  %s1025_s26 = smov [#allocation10]  }
  0x35   :  { %v116_v2 = vld [vmem:[#allocation5 + $0xe8] sm:$0xff]  ;;  %299 = vmatprep.subr.mxu0 %v118_v0  ;;  %v182_v3 = vld [vmem:[#allocation5 + $0x2f8] sm:$0xff]  ;;  %v115_v4 = vld [vmem:[#allocation5 + $0xe0] sm:$0xff]  ;;  %s850_s27 = sshll.u32 %s1025_s26, 4  ;;  %s851_s27 = int_to_ptr.vmem [resolvable:$true] %s850_s27 }
  0x36   :  { %v181_v5 = vld [vmem:[#allocation5 + $0x2f0] sm:$0xff]  ;;  %300 = vmatpush1.msra.mxu0 %v117_v1  ;;  %370 = vmatprep.subr.mxu1 %v182_v3  ;;  %v114_v6 = vld [vmem:[#allocation5 + $0xd8] sm:$0xff]  ;;  %v180_v7 = vld [vmem:[#allocation5 + $0x2e8] sm:$0xff]  ;;  %p993_p7 = scmp.lt.s32.totalorder %s851_s27, %s851_s27 }
  0x37   :  { %301 = vmatprep.subr.mxu0 %v116_v2  ;;  %371 = vmatpush1.msra.mxu1 %v181_v5  ;;  %v113_v8 = vld [vmem:[#allocation5 + $0xd0] sm:$0xff]  ;;  %v179_v9 = vld [vmem:[#allocation5 + $0x2e0] sm:$0xff]  ;;  %v178_v10 = vld [vmem:[#allocation5 + $0x2d8] sm:$0xff] }
  0x38   :  { %302 = vmatpush1.msra.mxu0 %v115_v4  ;;  %372 = vmatprep.subr.mxu1 %v180_v7  ;;  %v112_v11 = vld [vmem:[#allocation5 + $0xc8] sm:$0xff]  ;;  %v177_v12 = vld [vmem:[#allocation5 + $0x2d0] sm:$0xff]  ;;  %v111_v13 = vld [vmem:[#allocation5 + $0xc0] sm:$0xff] }
  0x39   :  { %303 = vmatprep.subr.mxu0 %v114_v6  ;;  %373 = vmatpush1.msra.mxu1 %v179_v9  ;;  %v176_v14 = vld [vmem:[#allocation5 + $0x2c8] sm:$0xff]  ;;  %v110_v15 = vld [vmem:[#allocation5 + $0xb8] sm:$0xff]  ;;  %v175_v16 = vld [vmem:[#allocation5 + $0x2c0] sm:$0xff] }
  0x3a   :  { %304 = vmatpush1.msra.mxu0 %v113_v8  ;;  %374 = vmatprep.subr.mxu1 %v178_v10  ;;  %v109_v17 = vld [vmem:[#allocation5 + $0xb0] sm:$0xff]  ;;  %v174_v18 = vld [vmem:[#allocation5 + $0x2b8] sm:$0xff]  ;;  %v108_v19 = vld [vmem:[#allocation5 + $0xa8] sm:$0xff] }
  0x3b   :  { %305 = vmatprep.subr.mxu0 %v112_v11  ;;  %375 = vmatpush1.msra.mxu1 %v177_v12  ;;  %v173_v20 = vld [vmem:[#allocation5 + $0x2b0] sm:$0xff]  ;;  %v107_v21 = vld [vmem:[#allocation5 + $0xa0] sm:$0xff]  ;;  %v172_v22 = vld [vmem:[#allocation5 + $0x2a8] sm:$0xff] }
  0x3c   :  { %306 = vmatpush1.msra.mxu0 %v111_v13  ;;  %376 = vmatprep.subr.mxu1 %v176_v14  ;;  %v106_v23 = vld [vmem:[#allocation5 + $0x98] sm:$0xff]  ;;  %v171_v24 = vld [vmem:[#allocation5 + $0x2a0] sm:$0xff]  ;;  %v105_v25 = vld [vmem:[#allocation5 + $0x90] sm:$0xff] }
  0x3d   :  { %307 = vmatprep.subr.mxu0 %v110_v15  ;;  %377 = vmatpush1.msra.mxu1 %v175_v16  ;;  %v170_v26 = vld [vmem:[#allocation5 + $0x298] sm:$0xff]  ;;  %v104_v27 = vld [vmem:[#allocation5 + $0x88] sm:$0xff]  ;;  %v169_v28 = vld [vmem:[#allocation5 + $0x290] sm:$0xff] }
  0x3e   :  { %308 = vmatpush1.msra.mxu0 %v109_v17  ;;  %378 = vmatprep.subr.mxu1 %v174_v18  ;;  %v103_v29 = vld [vmem:[#allocation5 + $0x80] sm:$0xff]  ;;  %v168_v30 = vld [vmem:[#allocation5 + $0x288] sm:$0xff]  ;;  %v102_v31 = vld [vmem:[#allocation5 + $0x78] sm:$0xff] }
  0x3f   :  { %309 = vmatprep.subr.mxu0 %v108_v19  ;;  %379 = vmatpush1.msra.mxu1 %v173_v20  ;;  %v167_v32 = vld [vmem:[#allocation5 + $0x280] sm:$0xff]  ;;  %v101_v33 = vld [vmem:[#allocation5 + $0x70] sm:$0xff]  ;;  %v166_v34 = vld [vmem:[#allocation5 + $0x278] sm:$0xff] }
  0x40   :  { %310 = vmatpush1.msra.mxu0 %v107_v21  ;;  %380 = vmatprep.subr.mxu1 %v172_v22  ;;  %v100_v35 = vld [vmem:[#allocation5 + $0x68] sm:$0xff]  ;;  %v165_v36 = vld [vmem:[#allocation5 + $0x270] sm:$0xff]  ;;  %v99_v37 = vld [vmem:[#allocation5 + $0x60] sm:$0xff] }
  0x41   :  { %311 = vmatprep.subr.mxu0 %v106_v23  ;;  %381 = vmatpush1.msra.mxu1 %v171_v24  ;;  %v164_v38 = vld [vmem:[#allocation5 + $0x268] sm:$0xff]  ;;  %v98_v39 = vld [vmem:[#allocation5 + $0x58] sm:$0xff]  ;;  %v163_v40 = vld [vmem:[#allocation5 + $0x260] sm:$0xff] }
  0x42   :  { %312 = vmatpush1.msra.mxu0 %v105_v25  ;;  %382 = vmatprep.subr.mxu1 %v170_v26  ;;  %v97_v41 = vld [vmem:[#allocation5 + $0x50] sm:$0xff]  ;;  %v162_v42 = vld [vmem:[#allocation5 + $0x258] sm:$0xff]  ;;  %v96_v43 = vld [vmem:[#allocation5 + $0x48] sm:$0xff] }
  0x43   :  { %313 = vmatprep.subr.mxu0 %v104_v27  ;;  %383 = vmatpush1.msra.mxu1 %v169_v28  ;;  %v161_v44 = vld [vmem:[#allocation5 + $0x250] sm:$0xff]  ;;  %v95_v45 = vld [vmem:[#allocation5 + $0x40] sm:$0xff]  ;;  %v160_v46 = vld [vmem:[#allocation5 + $0x248] sm:$0xff] }
  0x44   :  { %314 = vmatpush1.msra.mxu0 %v103_v29  ;;  %384 = vmatprep.subr.mxu1 %v168_v30  ;;  %v94_v47 = vld [vmem:[#allocation5 + $0x38] sm:$0xff]  ;;  %v159_v48 = vld [vmem:[#allocation5 + $0x240] sm:$0xff]  ;;  %v93_v49 = vld [vmem:[#allocation5 + $0x30] sm:$0xff] }
  0x45   :  { %315 = vmatprep.subr.mxu0 %v102_v31  ;;  %385 = vmatpush1.msra.mxu1 %v167_v32  ;;  %v158_v50 = vld [vmem:[#allocation5 + $0x238] sm:$0xff]  ;;  %v92_v51 = vld [vmem:[#allocation5 + $0x28] sm:$0xff]  ;;  %v157_v52 = vld [vmem:[#allocation5 + $0x230] sm:$0xff] }
  0x46   :  { %316 = vmatpush1.msra.mxu0 %v101_v33  ;;  %386 = vmatprep.subr.mxu1 %v166_v34  ;;  %v91_v53 = vld [vmem:[#allocation5 + $0x20] sm:$0xff]  ;;  %v156_v54 = vld [vmem:[#allocation5 + $0x228] sm:$0xff]  ;;  %v90_v55 = vld [vmem:[#allocation5 + $0x18] sm:$0xff] }
  0x47   :  { %317 = vmatprep.subr.mxu0 %v100_v35  ;;  %387 = vmatpush1.msra.mxu1 %v165_v36  ;;  %v155_v56 = vld [vmem:[#allocation5 + $0x220] sm:$0xff]  ;;  %v89_v57 = vld [vmem:[#allocation5 + $0x10] sm:$0xff]  ;;  %v154_v58 = vld [vmem:[#allocation5 + $0x218] sm:$0xff] }
  0x48   :  { %318 = vmatpush1.msra.mxu0 %v99_v37  ;;  %388 = vmatprep.subr.mxu1 %v164_v38  ;;  %v88_v59 = vld [vmem:[#allocation5 + $0x8] sm:$0xff]  ;;  %v153_v60 = vld [vmem:[#allocation5 + $0x210] sm:$0xff]  ;;  %v87_v61 = vld [vmem:[#allocation5] sm:$0xff] }
  0x49   :  { %319 = vmatprep.subr.mxu0 %v98_v39  ;;  %389 = vmatpush1.msra.mxu1 %v163_v40  ;;  %v152_v62 = vld [vmem:[#allocation5 + $0x208] sm:$0xff]  ;;  %v150_v63 = vld [vmem:[#allocation5 + $0x1f8] sm:$0xff]  ;;  %v151_v0 = vld [vmem:[#allocation5 + $0x200] sm:$0xff] }
  0x4a   :  { %320 = vmatpush1.msra.mxu0 %v97_v41  ;;  %390 = vmatprep.subr.mxu1 %v162_v42  ;;  %v149_v1 = vld [vmem:[#allocation5 + $0x1f0] sm:$0xff]  ;;  %v214_v2 = vld [vmem:[#allocation5 + $0x3f8] sm:$0xff]  ;;  %v148_v3 = vld [vmem:[#allocation5 + $0x1e8] sm:$0xff] }
  0x4b   :  { %321 = vmatprep.subr.mxu0 %v96_v43  ;;  %391 = vmatpush1.msra.mxu1 %v161_v44  ;;  %v213_v4 = vld [vmem:[#allocation5 + $0x3f0] sm:$0xff]  ;;  %v147_v5 = vld [vmem:[#allocation5 + $0x1e0] sm:$0xff]  ;;  %v212_v6 = vld [vmem:[#allocation5 + $0x3e8] sm:$0xff] }
  0x4c   :  { %322 = vmatpush1.msra.mxu0 %v95_v45  ;;  %392 = vmatprep.subr.mxu1 %v160_v46  ;;  %v146_v7 = vld [vmem:[#allocation5 + $0x1d8] sm:$0xff]  ;;  %v211_v8 = vld [vmem:[#allocation5 + $0x3e0] sm:$0xff]  ;;  %v145_v9 = vld [vmem:[#allocation5 + $0x1d0] sm:$0xff] }
  0x4d   :  { %323 = vmatprep.subr.mxu0 %v94_v47  ;;  %393 = vmatpush1.msra.mxu1 %v159_v48  ;;  %v210_v10 = vld [vmem:[#allocation5 + $0x3d8] sm:$0xff]  ;;  %v144_v11 = vld [vmem:[#allocation5 + $0x1c8] sm:$0xff]  ;;  %v209_v12 = vld [vmem:[#allocation5 + $0x3d0] sm:$0xff] }
  0x4e   :  { %324 = vmatpush1.msra.mxu0 %v93_v49  ;;  %394 = vmatprep.subr.mxu1 %v158_v50  ;;  %v143_v13 = vld [vmem:[#allocation5 + $0x1c0] sm:$0xff]  ;;  %v208_v14 = vld [vmem:[#allocation5 + $0x3c8] sm:$0xff]  ;;  %v142_v15 = vld [vmem:[#allocation5 + $0x1b8] sm:$0xff] }
  0x4f   :  { %325 = vmatprep.subr.mxu0 %v92_v51  ;;  %395 = vmatpush1.msra.mxu1 %v157_v52  ;;  %v207_v16 = vld [vmem:[#allocation5 + $0x3c0] sm:$0xff]  ;;  %v141_v17 = vld [vmem:[#allocation5 + $0x1b0] sm:$0xff]  ;;  %v206_v18 = vld [vmem:[#allocation5 + $0x3b8] sm:$0xff] }
  0x50   :  { %326 = vmatpush1.msra.mxu0 %v91_v53  ;;  %396 = vmatprep.subr.mxu1 %v156_v54  ;;  %v140_v19 = vld [vmem:[#allocation5 + $0x1a8] sm:$0xff]  ;;  %v205_v20 = vld [vmem:[#allocation5 + $0x3b0] sm:$0xff]  ;;  %v139_v21 = vld [vmem:[#allocation5 + $0x1a0] sm:$0xff] }
  0x51   :  { %327 = vmatprep.subr.mxu0 %v90_v55  ;;  %397 = vmatpush1.msra.mxu1 %v155_v56  ;;  %v204_v22 = vld [vmem:[#allocation5 + $0x3a8] sm:$0xff]  ;;  %v138_v23 = vld [vmem:[#allocation5 + $0x198] sm:$0xff]  ;;  %v203_v24 = vld [vmem:[#allocation5 + $0x3a0] sm:$0xff] }
  0x52   :  { %328 = vmatpush1.msra.mxu0 %v89_v57  ;;  %398 = vmatprep.subr.mxu1 %v154_v58  ;;  %v137_v25 = vld [vmem:[#allocation5 + $0x190] sm:$0xff]  ;;  %v202_v26 = vld [vmem:[#allocation5 + $0x398] sm:$0xff]  ;;  %v136_v27 = vld [vmem:[#allocation5 + $0x188] sm:$0xff] }
  0x53   :  { %329 = vmatprep.subr.mxu0 %v88_v59  ;;  %399 = vmatpush1.msra.mxu1 %v153_v60  ;;  %v201_v28 = vld [vmem:[#allocation5 + $0x390] sm:$0xff]  ;;  %v135_v29 = vld [vmem:[#allocation5 + $0x180] sm:$0xff]  ;;  %v200_v30 = vld [vmem:[#allocation5 + $0x388] sm:$0xff] }
  0x54   :  { %330 = vmatpush1.msra.mxu0 %v87_v61  ;;  %400 = vmatprep.subr.mxu1 %v152_v62  ;;  %v134_v31 = vld [vmem:[#allocation5 + $0x178] sm:$0xff]  ;;  %v199_v32 = vld [vmem:[#allocation5 + $0x380] sm:$0xff]  ;;  %v133_v33 = vld [vmem:[#allocation5 + $0x170] sm:$0xff] }
  0x55   :  { %331 = vmatprep.subr.mxu0 %v150_v63  ;;  %401 = vmatpush1.msra.mxu1 %v151_v0  ;;  %v198_v34 = vld [vmem:[#allocation5 + $0x378] sm:$0xff]  ;;  %v132_v35 = vld [vmem:[#allocation5 + $0x168] sm:$0xff]  ;;  %v197_v36 = vld [vmem:[#allocation5 + $0x370] sm:$0xff] }
  0x56   :  { %332 = vmatpush2.msra.mxu0 %v149_v1  ;;  %402 = vmatprep.subr.mxu1 %v214_v2  ;;  %v131_v37 = vld [vmem:[#allocation5 + $0x160] sm:$0xff]  ;;  %v196_v38 = vld [vmem:[#allocation5 + $0x368] sm:$0xff]  ;;  %v130_v39 = vld [vmem:[#allocation5 + $0x158] sm:$0xff] }
  0x57   :  { %333 = vmatprep.subr.mxu0 %v148_v3  ;;  %403 = vmatpush2.msra.mxu1 %v213_v4  ;;  %v195_v40 = vld [vmem:[#allocation5 + $0x360] sm:$0xff]  ;;  %v129_v41 = vld [vmem:[#allocation5 + $0x150] sm:$0xff]  ;;  %v194_v42 = vld [vmem:[#allocation5 + $0x358] sm:$0xff] }
  0x58   :  { %334 = vmatpush2.msra.mxu0 %v147_v5  ;;  %404 = vmatprep.subr.mxu1 %v212_v6  ;;  %v128_v43 = vld [vmem:[#allocation5 + $0x148] sm:$0xff]  ;;  %v193_v44 = vld [vmem:[#allocation5 + $0x350] sm:$0xff]  ;;  %v127_v45 = vld [vmem:[#allocation5 + $0x140] sm:$0xff] }
  0x59   :  { %335 = vmatprep.subr.mxu0 %v146_v7  ;;  %405 = vmatpush2.msra.mxu1 %v211_v8  ;;  %v192_v46 = vld [vmem:[#allocation5 + $0x348] sm:$0xff]  ;;  %v126_v47 = vld [vmem:[#allocation5 + $0x138] sm:$0xff]  ;;  %v191_v48 = vld [vmem:[#allocation5 + $0x340] sm:$0xff] }
  0x5a   :  { %336 = vmatpush2.msra.mxu0 %v145_v9  ;;  %406 = vmatprep.subr.mxu1 %v210_v10  ;;  %v125_v49 = vld [vmem:[#allocation5 + $0x130] sm:$0xff]  ;;  %v190_v50 = vld [vmem:[#allocation5 + $0x338] sm:$0xff]  ;;  %v124_v51 = vld [vmem:[#allocation5 + $0x128] sm:$0xff] }
  0x5b   :  { %337 = vmatprep.subr.mxu0 %v144_v11  ;;  %407 = vmatpush2.msra.mxu1 %v209_v12  ;;  %v189_v52 = vld [vmem:[#allocation5 + $0x330] sm:$0xff]  ;;  %v123_v53 = vld [vmem:[#allocation5 + $0x120] sm:$0xff]  ;;  %v188_v54 = vld [vmem:[#allocation5 + $0x328] sm:$0xff] }
  0x5c   :  { %338 = vmatpush2.msra.mxu0 %v143_v13  ;;  %408 = vmatprep.subr.mxu1 %v208_v14  ;;  %v122_v55 = vld [vmem:[#allocation5 + $0x118] sm:$0xff]  ;;  %v187_v56 = vld [vmem:[#allocation5 + $0x320] sm:$0xff]  ;;  %v121_v57 = vld [vmem:[#allocation5 + $0x110] sm:$0xff] }
  0x5d   :  { %339 = vmatprep.subr.mxu0 %v142_v15  ;;  %409 = vmatpush2.msra.mxu1 %v207_v16  ;;  %v186_v58 = vld [vmem:[#allocation5 + $0x318] sm:$0xff]  ;;  %v120_v59 = vld [vmem:[#allocation5 + $0x108] sm:$0xff]  ;;  %v81_v60 = vld [vmem:[#allocation2 + $0x8] sm:$0xff] }
  0x5e   :  { %340 = vmatpush2.msra.mxu0 %v141_v17  ;;  %410 = vmatprep.subr.mxu1 %v206_v18  ;;  %v119_v61 = vld [vmem:[#allocation5 + $0x100] sm:$0xff]  ;;  %v185_v62 = vld [vmem:[#allocation5 + $0x310] sm:$0xff]  ;;  %v80_v63 = vld [vmem:[#allocation2] sm:$0xff] }
  0x5f   :  { %341 = vmatprep.subr.mxu0 %v140_v19  ;;  %411 = vmatpush2.msra.mxu1 %v205_v20  ;;  %v184_v0 = vld [vmem:[#allocation5 + $0x308] sm:$0xff]  ;;  %v246_v1 = vld [vmem:[#allocation5 + $0x4f8] sm:$0xff]  ;;  %v183_v2 = vld [vmem:[#allocation5 + $0x300] sm:$0xff] }
  0x60   :  { %342 = vmatpush2.msra.mxu0 %v139_v21  ;;  %412 = vmatprep.subr.mxu1 %v204_v22  ;;  %v83_v3 = vld [vmem:[#allocation2 + $0x18] sm:$0xff]  ;;  %v245_v4 = vld [vmem:[#allocation5 + $0x4f0] sm:$0xff]  ;;  %v82_v5 = vld [vmem:[#allocation2 + $0x10] sm:$0xff]  ;;  %v1024_v22 = vmov 0.0  }
  0x61   :  { %343 = vmatprep.subr.mxu0 %v138_v23  ;;  %413 = vmatpush2.msra.mxu1 %v203_v24  ;;  %v244_v6 = vld [vmem:[#allocation5 + $0x4e8] sm:$0xff]  ;;  %v243_v7 = vld [vmem:[#allocation5 + $0x4e0] sm:$0xff]  ;;  %v282_v8 = vld [vmem:[#allocation5 + $0x618] sm:$0xff] }
  0x62   :  { %344 = vmatpush2.msra.mxu0 %v137_v25  ;;  %414 = vmatprep.subr.mxu1 %v202_v26  ;;  %v242_v9 = vld [vmem:[#allocation5 + $0x4d8] sm:$0xff]  ;;  %v281_v10 = vld [vmem:[#allocation5 + $0x610] sm:$0xff]  ;;  %v280_v12 = vld [vmem:[#allocation5 + $0x608] sm:$0xff] }
  0x63   :  { %345 = vmatprep.subr.mxu0 %v136_v27  ;;  %415 = vmatpush2.msra.mxu1 %v201_v28  ;;  %v241_v11 = vld [vmem:[#allocation5 + $0x4d0] sm:$0xff]  ;;  %v240_v13 = vld [vmem:[#allocation5 + $0x4c8] sm:$0xff]  ;;  %v239_v15 = vld [vmem:[#allocation5 + $0x4c0] sm:$0xff] }
  0x64   :  { %346 = vmatpush2.msra.mxu0 %v135_v29  ;;  %416 = vmatprep.subr.mxu1 %v200_v30  ;;  %v85_v14 = vld [vmem:[#allocation2 + $0x28] sm:$0xff]  ;;  %v279_v16 = vld [vmem:[#allocation5 + $0x600] sm:$0xff]  ;;  %v238_v17 = vld [vmem:[#allocation5 + $0x4b8] sm:$0xff] }
  0x65   :  { %347 = vmatprep.subr.mxu0 %v134_v31  ;;  %417 = vmatpush2.msra.mxu1 %v199_v32  ;;  %v237_v18 = vld [vmem:[#allocation5 + $0x4b0] sm:$0xff]  ;;  %v86_v19 = vld [vmem:[#allocation2 + $0x30] sm:$0xff]  ;;  %v236_v20 = vld [vmem:[#allocation5 + $0x4a8] sm:$0xff] }
  0x66   :  { %348 = vmatpush2.msra.mxu0 %v133_v33  ;;  %418 = vmatprep.subr.mxu1 %v198_v34  ;;  %v235_v21 = vld [vmem:[#allocation5 + $0x4a0] sm:$0xff]  ;;  %v234_v23 = vld [vmem:[#allocation5 + $0x498] sm:$0xff]  ;;  %v233_v24 = vld [vmem:[#allocation5 + $0x490] sm:$0xff] }
  0x67   :  { %349 = vmatprep.subr.mxu0 %v132_v35  ;;  %419 = vmatpush2.msra.mxu1 %v197_v36  ;;  %v232_v25 = vld [vmem:[#allocation5 + $0x488] sm:$0xff]  ;;  %v231_v26 = vld [vmem:[#allocation5 + $0x480] sm:$0xff]  ;;  %v230_v27 = vld [vmem:[#allocation5 + $0x478] sm:$0xff] }
  0x68   :  { %350 = vmatpush2.msra.mxu0 %v131_v37  ;;  %420 = vmatprep.subr.mxu1 %v196_v38  ;;  %v229_v28 = vld [vmem:[#allocation5 + $0x470] sm:$0xff]  ;;  %v228_v29 = vld [vmem:[#allocation5 + $0x468] sm:$0xff]  ;;  %v227_v30 = vld [vmem:[#allocation5 + $0x460] sm:$0xff] }
  0x69   :  { %351 = vmatprep.subr.mxu0 %v130_v39  ;;  %421 = vmatpush2.msra.mxu1 %v195_v40  ;;  %v226_v31 = vld [vmem:[#allocation5 + $0x458] sm:$0xff]  ;;  %v225_v32 = vld [vmem:[#allocation5 + $0x450] sm:$0xff]  ;;  %v224_v33 = vld [vmem:[#allocation5 + $0x448] sm:$0xff] }
  0x6a   :  { %352 = vmatpush2.msra.mxu0 %v129_v41  ;;  %422 = vmatprep.subr.mxu1 %v194_v42  ;;  %v223_v34 = vld [vmem:[#allocation5 + $0x440] sm:$0xff]  ;;  %v222_v35 = vld [vmem:[#allocation5 + $0x438] sm:$0xff]  ;;  %v221_v36 = vld [vmem:[#allocation5 + $0x430] sm:$0xff] }
  0x6b   :  { %353 = vmatprep.subr.mxu0 %v128_v43  ;;  %423 = vmatpush2.msra.mxu1 %v193_v44  ;;  %v220_v37 = vld [vmem:[#allocation5 + $0x428] sm:$0xff]  ;;  %v219_v38 = vld [vmem:[#allocation5 + $0x420] sm:$0xff]  ;;  %v218_v39 = vld [vmem:[#allocation5 + $0x418] sm:$0xff] }
  0x6c   :  { %354 = vmatpush2.msra.mxu0 %v127_v45  ;;  %424 = vmatprep.subr.mxu1 %v192_v46  ;;  %v217_v40 = vld [vmem:[#allocation5 + $0x410] sm:$0xff]  ;;  %v216_v41 = vld [vmem:[#allocation5 + $0x408] sm:$0xff]  ;;  %v215_v42 = vld [vmem:[#allocation5 + $0x400] sm:$0xff] }
  0x6d   :  { %355 = vmatprep.subr.mxu0 %v126_v47  ;;  %425 = vmatpush2.msra.mxu1 %v191_v48  ;;  %v278_v43 = vld [vmem:[#allocation5 + $0x5f8] sm:$0xff]  ;;  %v277_v44 = vld [vmem:[#allocation5 + $0x5f0] sm:$0xff]  ;;  %v276_v45 = vld [vmem:[#allocation5 + $0x5e8] sm:$0xff] }
  0x6e   :  { %356 = vmatpush2.msra.mxu0 %v125_v49  ;;  %426 = vmatprep.subr.mxu1 %v190_v50  ;;  %v275_v46 = vld [vmem:[#allocation5 + $0x5e0] sm:$0xff]  ;;  %v274_v47 = vld [vmem:[#allocation5 + $0x5d8] sm:$0xff]  ;;  %v273_v48 = vld [vmem:[#allocation5 + $0x5d0] sm:$0xff] }
  0x6f   :  { %357 = vmatprep.subr.mxu0 %v124_v51  ;;  %427 = vmatpush2.msra.mxu1 %v189_v52  ;;  %v272_v49 = vld [vmem:[#allocation5 + $0x5c8] sm:$0xff]  ;;  %v271_v50 = vld [vmem:[#allocation5 + $0x5c0] sm:$0xff]  ;;  %v270_v51 = vld [vmem:[#allocation5 + $0x5b8] sm:$0xff] }
  0x70   :  { %358 = vmatpush2.msra.mxu0 %v123_v53  ;;  %428 = vmatprep.subr.mxu1 %v188_v54  ;;  %v269_v52 = vld [vmem:[#allocation5 + $0x5b0] sm:$0xff]  ;;  %v268_v53 = vld [vmem:[#allocation5 + $0x5a8] sm:$0xff]  ;;  %v267_v54 = vld [vmem:[#allocation5 + $0x5a0] sm:$0xff] }
  0x71   :  { %359 = vmatprep.subr.mxu0 %v122_v55  ;;  %429 = vmatpush2.msra.mxu1 %v187_v56  ;;  %v266_v55 = vld [vmem:[#allocation5 + $0x598] sm:$0xff]  ;;  %v265_v56 = vld [vmem:[#allocation5 + $0x590] sm:$0xff] }
  0x72   :  { %360 = vmatpush2.msra.mxu0 %v121_v57  ;;  %430 = vmatprep.subr.mxu1 %v186_v58  ;;  %v264_v57 = vld [vmem:[#allocation5 + $0x588] sm:$0xff]  ;;  %v263_v58 = vld [vmem:[#allocation5 + $0x580] sm:$0xff] }
  0x73   :  { %361 = vmatprep.subr.mxu0 %v120_v59  ;;  %363 = vmatprep.mubr.f32.mxu0 %v81_v60  ;;  %v262_v59 = vld [vmem:[#allocation5 + $0x578] sm:$0xff]  ;;  %v261_v60 = vld [vmem:[#allocation5 + $0x570] sm:$0xff] }
  0x74   :  { %362 = vmatpush2.msra.mxu0 %v119_v61  ;;  %431 = vmatpush2.msra.mxu1 %v185_v62  ;;  %v260_v61 = vld [vmem:[#allocation5 + $0x568] sm:$0xff]  ;;  %v259_v62 = vld [vmem:[#allocation5 + $0x560] sm:$0xff] }
  0x75   :  { %364 = vmatmul.mubr.f32.vlgmr.msra.gmra.mxu0 %v80_v63  ;;  %432 = vmatprep.subr.mxu1 %v184_v0  ;;  %v258_v63 = vld [vmem:[#allocation5 + $0x558] sm:$0xff]  ;;  %v257_v0 = vld [vmem:[#allocation5 + $0x550] sm:$0xff] }
  0x76   :  { %441 = vmatprep.subr.mxu0 %v246_v1  ;;  %433 = vmatpush2.msra.mxu1 %v183_v2  ;;  %v256_v1 = vld [vmem:[#allocation5 + $0x548] sm:$0xff]  ;;  %v255_v2 = vld [vmem:[#allocation5 + $0x540] sm:$0xff] }
  0x77   :  { %434 = vmatprep.mubr.f32.mxu1 %v83_v3  ;;  %442 = vmatpush1.msra.mxu0 %v245_v4  ;;  %v254_v3 = vld [vmem:[#allocation5 + $0x538] sm:$0xff]  ;;  %v253_v4 = vld [vmem:[#allocation5 + $0x530] sm:$0xff] }
  0x78   :  { %435 = vmatmul.mubr.f32.vlgmr.msra.gmra.mxu1 %v82_v5  ;;  %443 = vmatprep.subr.mxu0 %v244_v6  ;;  %v252_v5 = vld [vmem:[#allocation5 + $0x528] sm:$0xff]  ;;  %v251_v6 = vld [vmem:[#allocation5 + $0x520] sm:$0xff] }
  0x79   :  { %444 = vmatpush1.msra.mxu0 %v243_v7  ;;  %540 = vmatprep.subr.mxu1 %v282_v8  ;;  %v250_v7 = vld [vmem:[#allocation5 + $0x518] sm:$0xff]  ;;  %v249_v8 = vld [vmem:[#allocation5 + $0x510] sm:$0xff] }
  0x7a   :  { %445 = vmatprep.subr.mxu0 %v242_v9  ;;  %541 = vmatpush1.msra.mxu1 %v281_v10  ;;  %v248_v9 = vld [vmem:[#allocation5 + $0x508] sm:$0xff]  ;;  %v247_v10 = vld [vmem:[#allocation5 + $0x500] sm:$0xff] }
  0x7b   :  { %446 = vmatpush1.msra.mxu0 %v241_v11  ;;  %542 = vmatprep.subr.mxu1 %v280_v12  ;;  %v84_v11 = vld [vmem:[#allocation2 + $0x20] sm:$0xff]  ;;  %v616_v12 = vld [vmem:[#allocation7 + $0xf8] sm:$0xff] }
  0x7c   :  { %447 = vmatprep.subr.mxu0 %v240_v13  ;;  %505 = vmatprep.mubr.f32.mxu0 %v85_v14  ;;  %v615_v13 = vld [vmem:[#allocation7 + $0xf0] sm:$0xff]  ;;  %v614_v14 = vld [vmem:[#allocation7 + $0xe8] sm:$0xff] }
  0x7d   :  { %448 = vmatpush1.msra.mxu0 %v239_v15  ;;  %543 = vmatpush1.msra.mxu1 %v279_v16  ;;  %v613_v15 = vld [vmem:[#allocation7 + $0xe0] sm:$0xff]  ;;  %v612_v16 = vld [vmem:[#allocation7 + $0xd8] sm:$0xff] }
  0x7e   :  { %449 = vmatprep.subr.mxu0 %v238_v17  ;;  %576 = vmatprep.mubr.f32.mxu1 %v1024_v22  ;;  %v611_v17 = vld [vmem:[#allocation7 + $0xd0] sm:$0xff]  ;;  %v606_v22 = vld [vmem:[#allocation7 + $0xa8] sm:$0xff] }
  0x7f   :  { %450 = vmatpush1.msra.mxu0 %v237_v18  ;;  %861 = vmatmul.mubr.msk.f32.vlgmr.msra.gmra.mxu1 %vm295_vm0, %v86_v19  ;;  %v610_v18 = vld [vmem:[#allocation7 + $0xc8] sm:$0xff]  ;;  %v609_v19 = vld [vmem:[#allocation7 + $0xc0] sm:$0xff] }
  0x80   :  { %451 = vmatprep.subr.mxu0 %v236_v20  ;;  %661 = vmatprep.subr.mxu1 %v616_v12  ;;  %v608_v20 = vld [vmem:[#allocation7 + $0xb8] sm:$0xff] }
  0x81   :  { %452 = vmatpush1.msra.mxu0 %v235_v21  ;;  %662 = vmatpush1.msra.mxu1 %v615_v13  ;;  %v607_v21 = vld [vmem:[#allocation7 + $0xb0] sm:$0xff]  ;;  %v765_v12 = vld [vmem:[#allocation8 + $0xf8] sm:$0xff] }
  0x82   :  { %453 = vmatprep.subr.mxu0 %v234_v23  ;;  %663 = vmatprep.subr.mxu1 %v614_v14  ;;  %v605_v23 = vld [vmem:[#allocation7 + $0xa0] sm:$0xff]  ;;  %v749_v13 = vld [vmem:[#allocation8 + $0x78] sm:$0xff]  ;;  %v764_v14 = vld [vmem:[#allocation8 + $0xf0] sm:$0xff] }
  0x83   :  { %454 = vmatpush1.msra.mxu0 %v233_v24  ;;  %664 = vmatpush1.msra.mxu1 %v613_v15  ;;  %v604_v24 = vld [vmem:[#allocation7 + $0x98] sm:$0xff]  ;;  %v748_v15 = vld [vmem:[#allocation8 + $0x70] sm:$0xff] }
  0x84   :  { %455 = vmatprep.subr.mxu0 %v232_v25  ;;  %665 = vmatprep.subr.mxu1 %v612_v16  ;;  %v603_v25 = vld [vmem:[#allocation7 + $0x90] sm:$0xff]  ;;  %v763_v16 = vld [vmem:[#allocation8 + $0xe8] sm:$0xff] }
  0x85   :  { %456 = vmatpush1.msra.mxu0 %v231_v26  ;;  %666 = vmatpush1.msra.mxu1 %v611_v17  ;;  %v602_v26 = vld [vmem:[#allocation7 + $0x88] sm:$0xff] }
  0x86   :  { %457 = vmatprep.subr.mxu0 %v230_v27  ;;  %667 = vmatprep.subr.mxu1 %v610_v18  ;;  %v601_v27 = vld [vmem:[#allocation7 + $0x80] sm:$0xff]  ;;  %v747_v17 = vld [vmem:[#allocation8 + $0x68] sm:$0xff] }
  0x87   :  { %458 = vmatpush1.msra.mxu0 %v229_v28  ;;  %668 = vmatpush1.msra.mxu1 %v609_v19  ;;  %v600_v28 = vld [vmem:[#allocation7 + $0x78] sm:$0xff]  ;;  %v762_v18 = vld [vmem:[#allocation8 + $0xe0] sm:$0xff] }
  0x88   :  { %459 = vmatprep.subr.mxu0 %v228_v29  ;;  %669 = vmatprep.subr.mxu1 %v608_v20  ;;  %v599_v29 = vld [vmem:[#allocation7 + $0x70] sm:$0xff]  ;;  %v746_v19 = vld [vmem:[#allocation8 + $0x60] sm:$0xff]  ;;  %v761_v20 = vld [vmem:[#allocation8 + $0xd8] sm:$0xff] }
  0x89   :  { %460 = vmatpush1.msra.mxu0 %v227_v30  ;;  %670 = vmatpush1.msra.mxu1 %v607_v21  ;;  %v598_v30 = vld [vmem:[#allocation7 + $0x68] sm:$0xff]  ;;  %v745_v21 = vld [vmem:[#allocation8 + $0x58] sm:$0xff] }
  0x8a   :  { %461 = vmatprep.subr.mxu0 %v226_v31  ;;  %671 = vmatprep.subr.mxu1 %v606_v22  ;;  %v597_v31 = vld [vmem:[#allocation7 + $0x60] sm:$0xff]  ;;  %v760_v22 = vld [vmem:[#allocation8 + $0xd0] sm:$0xff] }
  0x8b   :  { %462 = vmatpush1.msra.mxu0 %v225_v32  ;;  %672 = vmatpush1.msra.mxu1 %v605_v23  ;;  %v596_v32 = vld [vmem:[#allocation7 + $0x58] sm:$0xff]  ;;  %v744_v23 = vld [vmem:[#allocation8 + $0x50] sm:$0xff] }
  0x8c   :  { %463 = vmatprep.subr.mxu0 %v224_v33  ;;  %673 = vmatprep.subr.mxu1 %v604_v24  ;;  %v595_v33 = vld [vmem:[#allocation7 + $0x50] sm:$0xff]  ;;  %v759_v24 = vld [vmem:[#allocation8 + $0xc8] sm:$0xff] }
  0x8d   :  { %464 = vmatpush1.msra.mxu0 %v223_v34  ;;  %674 = vmatpush1.msra.mxu1 %v603_v25  ;;  %v594_v34 = vld [vmem:[#allocation7 + $0x48] sm:$0xff] }
  0x8e   :  { %465 = vmatprep.subr.mxu0 %v222_v35  ;;  %675 = vmatprep.subr.mxu1 %v602_v26  ;;  %v593_v35 = vld [vmem:[#allocation7 + $0x40] sm:$0xff]  ;;  %v743_v25 = vld [vmem:[#allocation8 + $0x48] sm:$0xff] }
  0x8f   :  { %466 = vmatpush1.msra.mxu0 %v221_v36  ;;  %676 = vmatpush1.msra.mxu1 %v601_v27  ;;  %v592_v36 = vld [vmem:[#allocation7 + $0x38] sm:$0xff]  ;;  %v758_v26 = vld [vmem:[#allocation8 + $0xc0] sm:$0xff] }
  0x90   :  { %467 = vmatprep.subr.mxu0 %v220_v37  ;;  %677 = vmatprep.subr.mxu1 %v600_v28  ;;  %v591_v37 = vld [vmem:[#allocation7 + $0x30] sm:$0xff]  ;;  %v742_v27 = vld [vmem:[#allocation8 + $0x40] sm:$0xff]  ;;  %v757_v28 = vld [vmem:[#allocation8 + $0xb8] sm:$0xff] }
  0x91   :  { %468 = vmatpush1.msra.mxu0 %v219_v38  ;;  %678 = vmatpush1.msra.mxu1 %v599_v29  ;;  %v590_v38 = vld [vmem:[#allocation7 + $0x28] sm:$0xff]  ;;  %v741_v29 = vld [vmem:[#allocation8 + $0x38] sm:$0xff] }
  0x92   :  { %469 = vmatprep.subr.mxu0 %v218_v39  ;;  %679 = vmatprep.subr.mxu1 %v598_v30  ;;  %v589_v39 = vld [vmem:[#allocation7 + $0x20] sm:$0xff]  ;;  %v756_v30 = vld [vmem:[#allocation8 + $0xb0] sm:$0xff] }
  0x93   :  { %470 = vmatpush1.msra.mxu0 %v217_v40  ;;  %680 = vmatpush1.msra.mxu1 %v597_v31  ;;  %v588_v40 = vld [vmem:[#allocation7 + $0x18] sm:$0xff]  ;;  %v740_v31 = vld [vmem:[#allocation8 + $0x30] sm:$0xff] }
  0x94   :  { %471 = vmatprep.subr.mxu0 %v216_v41  ;;  %681 = vmatprep.subr.mxu1 %v596_v32  ;;  %v587_v41 = vld [vmem:[#allocation7 + $0x10] sm:$0xff]  ;;  %v755_v32 = vld [vmem:[#allocation8 + $0xa8] sm:$0xff] }
  0x95   :  { %472 = vmatpush1.msra.mxu0 %v215_v42  ;;  %682 = vmatpush1.msra.mxu1 %v595_v33  ;;  %v586_v42 = vld [vmem:[#allocation7 + $0x8] sm:$0xff] }
  0x96   :  { %473 = vmatprep.subr.mxu0 %v278_v43  ;;  %683 = vmatprep.subr.mxu1 %v594_v34  ;;  %v585_v43 = vld [vmem:[#allocation7] sm:$0xff]  ;;  %v739_v33 = vld [vmem:[#allocation8 + $0x28] sm:$0xff] }
  0x97   :  { %474 = vmatpush2.msra.mxu0 %v277_v44  ;;  %684 = vmatpush1.msra.mxu1 %v593_v35  ;;  %v648_v44 = vld [vmem:[#allocation7 + $0x1f8] sm:$0xff]  ;;  %v754_v34 = vld [vmem:[#allocation8 + $0xa0] sm:$0xff] }
  0x98   :  { %475 = vmatprep.subr.mxu0 %v276_v45  ;;  %685 = vmatprep.subr.mxu1 %v592_v36  ;;  %v647_v45 = vld [vmem:[#allocation7 + $0x1f0] sm:$0xff]  ;;  %v738_v35 = vld [vmem:[#allocation8 + $0x20] sm:$0xff]  ;;  %v285_v36 = vlaneseq }
  0x99   :  { %476 = vmatpush2.msra.mxu0 %v275_v46  ;;  %686 = vmatpush1.msra.mxu1 %v591_v37  ;;  %v646_v46 = vld [vmem:[#allocation7 + $0x1e8] sm:$0xff] }
  0x9a   :  { %477 = vmatprep.subr.mxu0 %v274_v47  ;;  %687 = vmatprep.subr.mxu1 %v590_v38  ;;  %v645_v47 = vld [vmem:[#allocation7 + $0x1e0] sm:$0xff]  ;;  %v286_v37 = vshrl.u32 %v285_v36, 7 }
  0x9b   :  { %478 = vmatpush2.msra.mxu0 %v273_v48  ;;  %688 = vmatpush1.msra.mxu1 %v589_v39  ;;  %v644_v48 = vld [vmem:[#allocation7 + $0x1d8] sm:$0xff]  ;;  %v283_v39 = vld [vmem:[%s1092_s2] sm:$0x3] }
  0x9c   :  { %479 = vmatprep.subr.mxu0 %v272_v49  ;;  %689 = vmatprep.subr.mxu1 %v588_v40  ;;  %v643_v49 = vld [vmem:[#allocation7 + $0x1d0] sm:$0xff]  ;;  %v287_v38 = vsub.s32 0, %v286_v37  ;;  %v291_v40 = vsub.s32 1, %v286_v37 }
  0x9d   :  { %480 = vmatpush2.msra.mxu0 %v271_v50  ;;  %690 = vmatpush1.msra.mxu1 %v587_v41  ;;  %v642_v50 = vld [vmem:[#allocation7 + $0x1c8] sm:$0xff] }
  0x9e   :  { %481 = vmatprep.subr.mxu0 %v270_v51  ;;  %691 = vmatprep.subr.mxu1 %v586_v42  ;;  %v641_v51 = vld [vmem:[#allocation7 + $0x1c0] sm:$0xff]  ;;  %v288_v42 = vrot.slane %v283_v39, %v287_v38 }
  0x9f   :  { %482 = vmatpush2.msra.mxu0 %v269_v52  ;;  %692 = vmatpush1.msra.mxu1 %v585_v43  ;;  %v640_v52 = vld [vmem:[#allocation7 + $0x1b8] sm:$0xff]  ;;  %v292_v43 = vrot.slane %v283_v39, %v291_v40 }
  0xa0   :  { %483 = vmatprep.subr.mxu0 %v268_v53  ;;  %693 = vmatprep.subr.mxu1 %v648_v44  ;;  %v639_v53 = vld [vmem:[#allocation7 + $0x1b0] sm:$0xff] }
  0xa1   :  { %484 = vmatpush2.msra.mxu0 %v267_v54  ;;  %694 = vmatpush2.msra.mxu1 %v647_v45  ;;  %v638_v54 = vld [vmem:[#allocation7 + $0x1a8] sm:$0xff] }
  0xa2   :  { %485 = vmatprep.subr.mxu0 %v266_v55  ;;  %695 = vmatprep.subr.mxu1 %v646_v46  ;;  %v637_v55 = vld [vmem:[#allocation7 + $0x1a0] sm:$0xff] }
  0xa3   :  { %486 = vmatpush2.msra.mxu0 %v265_v56  ;;  %696 = vmatpush2.msra.mxu1 %v645_v47  ;;  %v636_v56 = vld [vmem:[#allocation7 + $0x198] sm:$0xff] }
  0xa4   :  { %487 = vmatprep.subr.mxu0 %v264_v57  ;;  %697 = vmatprep.subr.mxu1 %v644_v48  ;;  %v635_v57 = vld [vmem:[#allocation7 + $0x190] sm:$0xff] }
  0xa5   :  { %488 = vmatpush2.msra.mxu0 %v263_v58  ;;  %698 = vmatpush2.msra.mxu1 %v643_v49  ;;  %v634_v58 = vld [vmem:[#allocation7 + $0x188] sm:$0xff] }
  0xa6   :  { %489 = vmatprep.subr.mxu0 %v262_v59  ;;  %699 = vmatprep.subr.mxu1 %v642_v50  ;;  %v633_v59 = vld [vmem:[#allocation7 + $0x180] sm:$0xff] }
  0xa7   :  { %490 = vmatpush2.msra.mxu0 %v261_v60  ;;  %700 = vmatpush2.msra.mxu1 %v641_v51  ;;  %v632_v60 = vld [vmem:[#allocation7 + $0x178] sm:$0xff] }
  0xa8   :  { %491 = vmatprep.subr.mxu0 %v260_v61  ;;  %701 = vmatprep.subr.mxu1 %v640_v52  ;;  %v631_v61 = vld [vmem:[#allocation7 + $0x170] sm:$0xff] }
  0xa9   :  { %492 = vmatpush2.msra.mxu0 %v259_v62  ;;  %702 = vmatpush2.msra.mxu1 %v639_v53  ;;  %v630_v62 = vld [vmem:[#allocation7 + $0x168] sm:$0xff] }
  0xaa   :  { %493 = vmatprep.subr.mxu0 %v258_v63  ;;  %703 = vmatprep.subr.mxu1 %v638_v54  ;;  %v629_v63 = vld [vmem:[#allocation7 + $0x160] sm:$0xff] }
  0xab   :  { %494 = vmatpush2.msra.mxu0 %v257_v0  ;;  %704 = vmatpush2.msra.mxu1 %v637_v55  ;;  %v628_v0 = vld [vmem:[#allocation7 + $0x158] sm:$0xff] }
  0xac   :  { %495 = vmatprep.subr.mxu0 %v256_v1  ;;  %705 = vmatprep.subr.mxu1 %v636_v56  ;;  %v627_v1 = vld [vmem:[#allocation7 + $0x150] sm:$0xff] }
  0xad   :  { %496 = vmatpush2.msra.mxu0 %v255_v2  ;;  %706 = vmatpush2.msra.mxu1 %v635_v57  ;;  %v626_v2 = vld [vmem:[#allocation7 + $0x148] sm:$0xff] }
  0xae   :  { %497 = vmatprep.subr.mxu0 %v254_v3  ;;  %707 = vmatprep.subr.mxu1 %v634_v58  ;;  %v625_v3 = vld [vmem:[#allocation7 + $0x140] sm:$0xff] }
  0xaf   :  { %498 = vmatpush2.msra.mxu0 %v253_v4  ;;  %708 = vmatpush2.msra.mxu1 %v633_v59  ;;  %v624_v4 = vld [vmem:[#allocation7 + $0x138] sm:$0xff] }
  0xb0   :  { %499 = vmatprep.subr.mxu0 %v252_v5  ;;  %709 = vmatprep.subr.mxu1 %v632_v60  ;;  %v623_v5 = vld [vmem:[#allocation7 + $0x130] sm:$0xff] }
  0xb1   :  { %500 = vmatpush2.msra.mxu0 %v251_v6  ;;  %710 = vmatpush2.msra.mxu1 %v631_v61  ;;  %v622_v6 = vld [vmem:[#allocation7 + $0x128] sm:$0xff]  ;;  %v753_v61 = vld [vmem:[#allocation8 + $0x98] sm:$0xff] }
  0xb2   :  { %501 = vmatprep.subr.mxu0 %v250_v7  ;;  %711 = vmatprep.subr.mxu1 %v630_v62  ;;  %v621_v7 = vld [vmem:[#allocation7 + $0x120] sm:$0xff]  ;;  %v737_v62 = vld [vmem:[#allocation8 + $0x18] sm:$0xff] }
  0xb3   :  { %502 = vmatpush2.msra.mxu0 %v249_v8  ;;  %712 = vmatpush2.msra.mxu1 %v629_v63  ;;  %v620_v8 = vld [vmem:[#allocation7 + $0x118] sm:$0xff]  ;;  %v752_v63 = vld [vmem:[#allocation8 + $0x90] sm:$0xff] }
  0xb4   :  { %503 = vmatprep.subr.mxu0 %v248_v9  ;;  %713 = vmatprep.subr.mxu1 %v628_v0  ;;  %v619_v9 = vld [vmem:[#allocation7 + $0x110] sm:$0xff] }
  0xb5   :  { %504 = vmatpush2.msra.mxu0 %v247_v10  ;;  %714 = vmatpush2.msra.mxu1 %v627_v1  ;;  %v618_v10 = vld [vmem:[#allocation7 + $0x108] sm:$0xff]  ;;  %v736_v0 = vld [vmem:[#allocation8 + $0x10] sm:$0xff] }
  0xb6   :  { %506 = vmatmul.mubr.f32.vlgmr.msra.gmra.mxu0 %v84_v11  ;;  %715 = vmatprep.subr.mxu1 %v626_v2  ;;  %v617_v11 = vld [vmem:[#allocation7 + $0x100] sm:$0xff]  ;;  %v751_v1 = vld [vmem:[#allocation8 + $0x88] sm:$0xff] }
  0xb7   :  { %716 = vmatpush2.msra.mxu1 %v625_v3  ;;  %863 = vmatprep.subr.mxu0 %v765_v12  ;;  %v735_v2 = vld [vmem:[#allocation8 + $0x8] sm:$0xff]  ;;  %v750_v3 = vld [vmem:[#allocation8 + $0x80] sm:$0xff] }
  0xb8   :  { %717 = vmatprep.subr.mxu1 %v624_v4  ;;  %864 = vmatpush3.msra.mxu0 %v749_v13  ;;  %v734_v4 = vld [vmem:[#allocation8] sm:$0xff] }
  0xb9   :  { %718 = vmatpush2.msra.mxu1 %v623_v5  ;;  %865 = vmatprep.subr.mxu0 %v764_v14  ;;  %v649_v5 = vld [vmem:[%s1094_s4] sm:$0x3]  ;;  %s988_s4 = scalar_lea.vmem %s851_s27, 128 }
  0xba   :  { %719 = vmatprep.subr.mxu1 %v622_v6  ;;  %866 = vmatpush3.msra.mxu0 %v748_v15  ;;  %v654_v6 = vrot.slane %v649_v5, %v287_v38  ;;  %v862_v15 = vld [vmem:[%s1096_s6] ss:$0 sm:$0xff]  ;;  %p989_p6 = scmp.ne.s32.totalorder %s851_s27, %s988_s4  ;;  %p994_p8 = scmp.lt.s32.totalorder %s988_s4, %s988_s4 }
  0xbb   :  { %720 = vmatpush2.msra.mxu1 %v621_v7  ;;  %867 = vmatprep.subr.mxu0 %v763_v16  ;;  %v658_v7 = vrot.slane %v649_v5, %v291_v40 }
  0xbc   :  { %721 = vmatprep.subr.mxu1 %v620_v8  ;;  %868 = vmatpush3.msra.mxu0 %v747_v17  ;;  %p995_p9 = por %p994_p8, %p993_p7 }
  0xbd   :  { %722 = vmatpush2.msra.mxu1 %v619_v9  ;;  %869 = vmatprep.subr.mxu0 %v762_v18 }
  0xbe   :  { %723 = vmatprep.subr.mxu1 %v618_v10  ;;  %870 = vmatpush3.msra.mxu0 %v746_v19  ;;  %p996_p10 = pnand %p995_p9, %p989_p6 }
  0xbf   :  { %724 = vmatpush2.msra.mxu1 %v617_v11  ;;  %871 = vmatprep.subr.mxu0 %v761_v20 }
  0xc0   :  { %872 = vmatpush3.msra.mxu0 %v745_v21 }
  0xc1   :  { %873 = vmatprep.subr.mxu0 %v760_v22 }
  0xc2   :  { %874 = vmatpush3.msra.mxu0 %v744_v23 }
  0xc3   :  { %875 = vmatprep.subr.mxu0 %v759_v24 }
  0xc4   :  { %876 = vmatpush3.msra.mxu0 %v743_v25 }
  0xc5   :  { %877 = vmatprep.subr.mxu0 %v758_v26 }
  0xc6   :  { %878 = vmatpush3.msra.mxu0 %v742_v27 }
  0xc7   :  { %879 = vmatprep.subr.mxu0 %v757_v28 }
  0xc8   :  { %880 = vmatpush3.msra.mxu0 %v741_v29 }
  0xc9   :  { %881 = vmatprep.subr.mxu0 %v756_v30 }
  0xca   :  { %882 = vmatpush3.msra.mxu0 %v740_v31 }
  0xcb   :  { %883 = vmatprep.subr.mxu0 %v755_v32 }
  0xcc   :  { %884 = vmatpush3.msra.mxu0 %v739_v33 }
  0xcd   :  { %885 = vmatprep.subr.mxu0 %v754_v34 }
  0xce   :  { %886 = vmatpush3.msra.mxu0 %v738_v35 }
  0xcf   :  { %887 = vmatprep.subr.mxu0 %v753_v61 }
  0xd0   :  { %888 = vmatpush3.msra.mxu0 %v737_v62 }
  0xd1   :  { %889 = vmatprep.subr.mxu0 %v752_v63 }
  0xd2   :  { %890 = vmatpush3.msra.mxu0 %v736_v0 }
  0xd3   :  { %891 = vmatprep.subr.mxu0 %v751_v1 }
  0xd4   :  { %892 = vmatpush3.msra.mxu0 %v735_v2 }
  0xd5   :  { %893 = vmatprep.subr.mxu0 %v750_v3 }
  0xd6   :  { %894 = vmatpush3.msra.mxu0 %v734_v4 }
 0x135   :  { %v365_v41 = vpop.f32.mrf.mxu0 }
 0x136   :  { %v366_v46 = vadd.f32 %v365_v41, %v288_v42 }
 0x137   :  { %v367_v44 = vpop.f32.mrf.mxu0 }
 0x138   :  { %v436_v45 = vpop.f32.mrf.mxu1  ;;  %v368_v47 = vadd.f32 %v367_v44, %v292_v43 }
 0x139   :  { %v437_v49 = vadd.f32 %v436_v45, %v366_v46 }
 0x13a   :  { %v438_v48 = vpop.f32.mrf.mxu1 }
 0x13b   :  { %v439_v52 = vadd.f32 %v438_v48, %v368_v47 }
 0x13f   :  { %v578_v51 = vpop.f32.mrf.mxu1 }
 0x141   :  { %v580_v57 = vpop.f32.mrf.mxu1 }
 0x176   :  { %v507_v50 = vpop.f32.mrf.mxu0 }
 0x177   :  { %v508_v53 = vadd.f32 %v507_v50, %v437_v49 }
 0x178   :  { %v509_v54 = vpop.f32.mrf.mxu0 }
 0x179   :  { %v510_v55 = vadd.f32 %v509_v54, %v439_v52  ;;  %v579_v56 = vadd.f32 %v578_v51, %v508_v53 }
 0x17b   :  { %v581_v58 = vadd.f32 %v580_v57, %v510_v55  ;;  %v583_v60 = vmax.f32 %v579_v56, 0.0 }
 0x17d   :  { %v584_v59 = vmax.f32 %v581_v58, 0.0 }
 0x17f   :  { %725 = vmatprep.mubr.f32.mxu1 %v584_v59 }
 0x180   :  { %726 = vmatmul.mubr.f32.vlgmr.msra.gmra.mxu1 %v583_v60 }
 0x240   :  { %v727_v8 = vpop.f32.mrf.mxu1 }
 0x241   :  { %v728_v9 = vadd.f32 %v727_v8, %v654_v6 }
 0x242   :  { %v729_v10 = vpop.f32.mrf.mxu1 }
 0x243   :  { %v730_v11 = vadd.f32 %v729_v10, %v658_v7  ;;  %v732_v13 = vmax.f32 %v728_v9, 0.0 }
 0x245   :  { %v733_v12 = vmax.f32 %v730_v11, 0.0 }
 0x247   :  { %837 = vmatprep.mubr.f32.mxu0 %v733_v12 }
 0x248   :  { %838 = vmatmul.mubr.f32.vlgmr.msra.gmra.mxu0 %v732_v13 }
 0x308   :  { %v895_v14 = vpop.f32.mrf.mxu0 }
 0x30a   :  { %v896_v16 = vpop.f32.mrf.mxu0 }
 0x30b   :  { %v897_v17 = vadd.f32 %v896_v16, %v895_v14 }
 0x30d   :  { %v840_v18 = vadd.f32 %v897_v17, %v862_v15 }
 0x30f   :  { %843 = vst [vmem:[#allocation10] sm:$0xff] %v840_v18 }
 0x310   :  { %999 = shalt.err (!%p996_p10)
}
 0x311   :  { %853 = dma.vmem_to_hbm [thread:$0]  %s851_s27, 128, %s1097_s7, [#allocation4]  }
 0x312   :  { %1014 = dma.done.wait [#allocation4], 128  }
 0x313   :  { %1015 = vsyncadd [#allocation4], 4294967168 }
 0x314   :  { %857 = vsyncpa [#allocation3], 1 }
 0x315   :  { %858 = vsyncpa [#allocation6], 1 }
 0x316   :  { %859 = vsyncpa [#allocation9], 1 }
 0x317   :  { %860 = vsyncpa [#allocation4], 1 }

</bundles_post_ra>
